<compile_context>
chip_gen: v7x
topology: tpu7x:2x2x1
jax: 0.10.0
libtpu: 0.0.40
codegen_flags: <defaults>
</compile_context>

<pallas_src>
import functools

import jax
import jax.numpy as jnp
from jax import lax
from jax.experimental import pallas as pl
from jax.experimental.pallas import tpu as pltpu


def _round_up(x, m):
    return ((x + m - 1) // m) * m


def _absorbed_attn_kernel(x_ref, ckv_ref, wabs_ref, babs_ref, wbd_ref, o_ref,
                          qa_sc, m_sc, l_sc, acc_sc,
                          *, num_heads, head_dim, lora_rank, seq_len, block_l,
                          compute_dtype):
    del head_dim  # implied by the block-diagonal un-absorb weight's column count
    H, R = num_heads, lora_rank
    TB = x_ref.shape[0]
    li = pl.program_id(1)
    cdt = compute_dtype
    exact = jnp.dtype(cdt) == jnp.dtype(jnp.float32)

    # ---- once per batch block: fused absorbed-q projection + accumulator init.
    @pl.when(li == 0)
    def _init():
        qa_flat = (jnp.dot(x_ref[...], wabs_ref[...],
                           preferred_element_type=jnp.float32)
                   + babs_ref[...])                              # [TB, H*R] f32
        qa_sc[...] = qa_flat.reshape(TB, H, R)                   # one reshape / block
        m_sc[...] = jnp.full(m_sc.shape, -jnp.inf, jnp.float32)
        l_sc[...] = jnp.zeros(l_sc.shape, jnp.float32)
        acc_sc[...] = jnp.zeros(acc_sc.shape, jnp.float32)

    qa = qa_sc[...]                                              # [TB, H, R] f32
    ckv = ckv_ref[...]                                           # [TB, TL, R] cdt

    # ---- scores[b,h,l] = sum_r qa[b,h,r] * ckv[b,l,r]
    # VPU broadcast-multiply + reduce (per-batch KV => MXU would see <=H rows).
    scores = jnp.sum(qa[:, :, None, :] * ckv[:, None, :, :], axis=-1)   # [TB,H,TL] f32

    if seq_len % block_l != 0:
        # Mask zero-padded L positions of the (only) partial block.
        pos = li * block_l + lax.broadcasted_iota(jnp.int32, scores.shape, 2)
        scores = jnp.where(pos < seq_len, scores, -jnp.inf)

    # ---- online softmax over L.
    m_prev = m_sc[...]                                           # [TB, H]
    m_new = jnp.maximum(m_prev, jnp.max(scores, axis=-1))
    alpha = jnp.exp(m_prev - m_new)                              # [TB, H]
    p = jnp.exp(scores - m_new[:, :, None])                      # [TB, H, TL]
    l_sc[...] = alpha * l_sc[...] + jnp.sum(p, axis=-1)
    # ctx_blk[b,h,r] = sum_l p[b,h,l] * ckv[b,l,r]
    ctx_blk = jnp.sum(p[:, :, :, None] * ckv[:, None, :, :], axis=2)    # [TB,H,R] f32
    acc_sc[...] = alpha[:, :, None] * acc_sc[...] + ctx_blk
    m_sc[...] = m_new

    # ---- finalize: normalize + block-diagonal un-absorb (single dense MXU matmul,
    # output already lane-dense / padded -> unmasked stores).
    @pl.when(li == pl.num_programs(1) - 1)
    def _finalize():
        inv_l = pl.reciprocal(l_sc[...], approx=not exact)       # [TB, H]
        ctx = acc_sc[...] * inv_l[:, :, None]                    # [TB, H, R] f32
        out = jnp.dot(ctx.reshape(TB, H * R).astype(cdt), wbd_ref[...],
                      preferred_element_type=jnp.float32)        # [TB, HK_pad] f32
        o_ref[...] = out.astype(o_ref.dtype)


def fuse_absorbed_weights(wq_t, bq, w_kc, *, num_heads, head_dim, lora_rank):
    """Offline fusion of the q projection with w_kc (the 'absorbed' form).

    W_abs[d, h*R + r] = sum_k Wq_t[d, h*K + k] * w_kc[h, k, r]
    b_abs[h*R + r]    = sum_k bq[h*K + k]      * w_kc[h, k, r]
    """
    H, K, R = num_heads, head_dim, lora_rank
    Dq = wq_t.shape[0]
    wq_dhk = wq_t.astype(jnp.float32).reshape(Dq, H, K)
    w_kc32 = w_kc.astype(jnp.float32)
    w_abs = jnp.einsum('dhk,hkr->dhr', wq_dhk, w_kc32).reshape(Dq, H * R)
    b_abs = jnp.einsum('hk,hkr->hr', bq.astype(jnp.float32).reshape(H, K),
                       w_kc32).reshape(1, H * R)
    return w_abs, b_abs


def make_blockdiag_unabsorb(w_vc, *, num_heads, head_dim, lora_rank, out_cols):
    """W_bd[h*R + r, h*K + k] = w_vc[h, k, r]; zero elsewhere; zero-padded columns."""
    H, K, R = num_heads, head_dim, lora_rank
    eye = jnp.eye(H, dtype=jnp.float32)
    w_bd = jnp.einsum('hkr,hg->hrgk', w_vc.astype(jnp.float32), eye)
    w_bd = w_bd.reshape(H * R, H * K)
    if out_cols > H * K:
        w_bd = jnp.pad(w_bd, ((0, 0), (0, out_cols - H * K)))
    return w_bd


def simple_absorbed_attention(hidden_states_q, compressed_kv,
                              wq_t, bq, w_kc, w_vc,
                              *, num_heads, head_dim, lora_rank,
                              block_b=None, block_l=None,
                              compute_dtype=jnp.bfloat16):
    B, Dq = hidden_states_q.shape
    _, L, R = compressed_kv.shape
    H, K = num_heads, head_dim
    HK, HR = H * K, H * R
    assert R == lora_rank
    out_dtype = hidden_states_q.dtype

    # --- generation-aware VMEM budget / tile defaults. ---
    try:
        vmem_cap = int(pltpu.get_tpu_info().vmem_capacity_bytes)
    except Exception:
        vmem_cap = 64 * 1024 * 1024
    vmem_limit = min(int(0.75 * vmem_cap), 100 * 1024 * 1024)   # ~96 MiB v5e/v6e, ~48 MiB v7x

    if block_b is None:
        block_b = 256 if vmem_cap >= (100 << 20) else 128
    TB = min(block_b, B)
    if TB < B:
        TB = max(8, (TB // 8) * 8)
    B_pad = _round_up(B, TB)

    if block_l is None:
        block_l = L if L <= 128 else 128
    TL = min(block_l, L)
    if TL < L:
        TL = max(8, (TL // 8) * 8)
    L_pad = _round_up(L, TL)

    HK_pad = _round_up(HK, 128)                                  # lane-dense output slab

    # --- offline weight prep: absorb Wq into w_kc, block-diagonalize w_vc. ---
    w_abs, b_abs = fuse_absorbed_weights(
        wq_t, bq, w_kc, num_heads=H, head_dim=K, lora_rank=R)
    w_abs = w_abs.astype(compute_dtype)
    w_bd = make_blockdiag_unabsorb(
        w_vc, num_heads=H, head_dim=K, lora_rank=R, out_cols=HK_pad).astype(compute_dtype)

    # --- wrapper-side casts: halves the dominant per-step HBM stream (ckv). ---
    x = hidden_states_q.astype(compute_dtype)
    ckv = compressed_kv.astype(compute_dtype)

    if B_pad != B:
        x = jnp.pad(x, ((0, B_pad - B), (0, 0)))
        ckv = jnp.pad(ckv, ((0, B_pad - B), (0, 0), (0, 0)))
    if L_pad != L:
        ckv = jnp.pad(ckv, ((0, 0), (0, L_pad - L), (0, 0)))     # masked in-kernel

    kernel = functools.partial(
        _absorbed_attn_kernel, num_heads=H, head_dim=K, lora_rank=R,
        seq_len=L, block_l=TL, compute_dtype=compute_dtype)

    out = pl.pallas_call(
        kernel,
        out_shape=jax.ShapeDtypeStruct((B_pad, HK_pad), out_dtype),
        grid_spec=pltpu.PrefetchScalarGridSpec(
            num_scalar_prefetch=0,
            grid=(B_pad // TB, L_pad // TL),
            in_specs=[
                pl.BlockSpec((TB, Dq), lambda b, l: (b, 0)),        # hidden_states_q
                pl.BlockSpec((TB, TL, R), lambda b, l: (b, l, 0)),  # compressed_kv
                # TODO(synk): single-buffer these constant-index weights
                # (pipeline_mode=pl.Buffered(1) / persistent VMEM scratch) when H*R
                # is large enough that double-buffering them costs batch-tile VMEM.
                pl.BlockSpec((Dq, HR), lambda b, l: (0, 0)),        # fused W_abs
                pl.BlockSpec((1, HR), lambda b, l: (0, 0)),         # fused b_abs (f32)
                pl.BlockSpec((HR, HK_pad), lambda b, l: (0, 0)),    # block-diag w_vc
            ],
            out_specs=pl.BlockSpec((TB, HK_pad), lambda b, l: (b, 0)),
            scratch_shapes=[
                pltpu.VMEM((TB, H, R), jnp.float32),   # absorbed query (per b-block)
                pltpu.VMEM((TB, H), jnp.float32),      # running max m
                pltpu.VMEM((TB, H), jnp.float32),      # running denom l
                pltpu.VMEM((TB, H, R), jnp.float32),   # context accumulator
            ],
        ),
        compiler_params=pltpu.CompilerParams(
            dimension_semantics=("parallel", "arbitrary"),
            vmem_limit_bytes=int(vmem_limit),
        ),
    )(x, ckv, w_abs, b_abs, w_bd)

    # TODO(synk): if HK_pad >> HK and B is large, keep the padded layout downstream
    # instead of paying this extra full-output HBM round trip.
    if B_pad != B or HK_pad != HK:
        out = out[:B, :HK]
    return out


def reference_absorbed_attention(hidden_states_q, compressed_kv,
                                 wq_t, bq, w_kc, w_vc,
                                 *, num_heads, head_dim, lora_rank):
    B = hidden_states_q.shape[0]
    H, K, R = num_heads, head_dim, lora_rank
    q = hidden_states_q @ wq_t + bq.reshape(1, H * K)            # [B, H*K]
    q = q.reshape(B, H, K)
    qa = jnp.einsum('hkr,bhk->bhr', w_kc, q)                     # [B, H, R]
    scores = jnp.einsum('bhr,blr->bhl', qa, compressed_kv)       # [B, H, L]
    probs = jax.nn.softmax(scores, axis=-1)
    ctx = jnp.einsum('bhl,blr->bhr', probs, compressed_kv)       # [B, H, R]
    out = jnp.einsum('hkr,bhr->bhk', w_vc, ctx)                  # [B, H, K]
    return out.reshape(B, H * K)


if __name__ == "__main__":
    # Small shapes consistent with the module's forward.
    B = 2            # batch
    H = 4            # num_heads
    K = 16           # head_dim
    R = 32           # lora_rank
    Dq = 32          # q_lora_rank
    L = 8            # kv sequence length
    dtype = jnp.float32

    key = jax.random.PRNGKey(0)
    k_x, k_kv, k_wq, k_bq, k_wk, k_wv = jax.random.split(key, 6)

    hidden_states_q = jax.random.normal(k_x, (B, Dq), dtype=dtype)
    compressed_kv = jax.random.normal(k_kv, (B, L, R), dtype=dtype)

    # Deterministic synthetic parameters (shapes match torch.nn.Linear).
    # q_proj.weight: [H*K, Dq] -> pass transposed as [Dq, H*K]
    wq = jax.random.normal(k_wq, (H * K, Dq), dtype=dtype) * 0.1
    wq_t = wq.T
    bq = (jax.random.normal(k_bq, (H * K,), dtype=dtype) * 0.1).reshape(1, H * K)
    # k_proj.weight / v_proj.weight: [H*K, R] viewed as [H, K, R]
    w_kc = (jax.random.normal(k_wk, (H * K, R), dtype=dtype) * 0.1).reshape(H, K, R)
    w_vc = (jax.random.normal(k_wv, (H * K, R), dtype=dtype) * 0.1).reshape(H, K, R)

    ref = reference_absorbed_attention(hidden_states_q, compressed_kv,
                                       wq_t, bq, w_kc, w_vc,
                                       num_heads=H, head_dim=K, lora_rank=R)
    ref = jax.block_until_ready(ref)

    # Default path: bf16 MXU/VPU operands, f32 accumulation, approx EUP reciprocal.
    out = simple_absorbed_attention(hidden_states_q, compressed_kv,
                                    wq_t, bq, w_kc, w_vc,
                                    num_heads=H, head_dim=K, lora_rank=R)
    out = jax.block_until_ready(out)
    assert out.shape == (B, H * K)
    assert jnp.allclose(out.astype(jnp.float32), ref, atol=5e-2, rtol=5e-2), \
        "bf16 kernel mismatch vs reference"

    # Opt-in f32 validation path (exact reciprocal): tight check (small slack only
    # for offline weight-fusion reassociation).
    out_f32 = simple_absorbed_attention(hidden_states_q, compressed_kv,
                                        wq_t, bq, w_kc, w_vc,
                                        num_heads=H, head_dim=K, lora_rank=R,
                                        compute_dtype=jnp.float32)
    out_f32 = jax.block_until_ready(out_f32)
    assert jnp.allclose(out_f32, ref, atol=2e-3, rtol=2e-3), \
        "f32 kernel mismatch vs reference"

    print("KERNEL_OK")
</pallas_src>

<mosaic_0001>
module attributes {stable_mosaic.version = 11 : i64} {
  func.func @_absorbed_attn_kernel(%arg0: i32, %arg1: i32, %arg2: memref<2x32xbf16, #tpu.memory_space<vmem>>, %arg3: memref<2x8x32xbf16, #tpu.memory_space<vmem>>, %arg4: memref<32x128xbf16, #tpu.memory_space<vmem>>, %arg5: memref<1x128xf32, #tpu.memory_space<vmem>>, %arg6: memref<128x128xbf16, #tpu.memory_space<vmem>>, %arg7: memref<2x128xf32, #tpu.memory_space<vmem>>, %arg8: memref<2x4x32xf32, #tpu.memory_space<vmem>>, %arg9: memref<2x4xf32, #tpu.memory_space<vmem>>, %arg10: memref<2x4xf32, #tpu.memory_space<vmem>>, %arg11: memref<2x4x32xf32, #tpu.memory_space<vmem>>) attributes {dimension_semantics = [#tpu.dimension_semantics<parallel>, #tpu.dimension_semantics<arbitrary>], iteration_bounds = array<i64: 1, 1>, scalar_prefetch = 0 : i64, scratch_operands = 4 : i64, tpu.core_type = #tpu.core_type<tc>, window_params = [{transform_indices = @transform_0, window_bounds = array<i64: 2, 32>}, {transform_indices = @transform_1, window_bounds = array<i64: 2, 8, 32>}, {pipeline_mode = #tpu.pipeline_mode<synchronous>, transform_indices = @transform_2, window_bounds = array<i64: 32, 128>}, {pipeline_mode = #tpu.pipeline_mode<synchronous>, transform_indices = @transform_3, window_bounds = array<i64: 1, 128>}, {pipeline_mode = #tpu.pipeline_mode<synchronous>, transform_indices = @transform_4, window_bounds = array<i64: 128, 128>}, {transform_indices = @transform_5, window_bounds = array<i64: 2, 128>}]} {
    %c0_i32 = arith.constant 0 : i32
    %0 = arith.cmpi eq, %arg1, %c0_i32 : i32
    %1 = arith.extui %0 : i1 to i32
    %c0_i32_0 = arith.constant 0 : i32
    %2 = arith.cmpi ne, %1, %c0_i32_0 : i32
    scf.if %2 {
      %c0_25 = arith.constant 0 : index
      %c0_26 = arith.constant 0 : index
      %43 = vector.load %arg2[%c0_25, %c0_26] : memref<2x32xbf16, #tpu.memory_space<vmem>>, vector<2x32xbf16>
      %c0_27 = arith.constant 0 : index
      %c0_28 = arith.constant 0 : index
      %44 = vector.load %arg4[%c0_27, %c0_28] : memref<32x128xbf16, #tpu.memory_space<vmem>>, vector<32x128xbf16>
      %cst_29 = arith.constant dense<0.000000e+00> : vector<2x128xf32>
      %45 = tpu.matmul %43, %44, %cst_29 {dimension_numbers = #tpu.dot_dimension_numbers<[1], [0], [0], [1], [0, 0, 1, 1], [], []>} : vector<2x32xbf16>, vector<32x128xbf16>, vector<2x128xf32> -> vector<2x128xf32>
      %c0_30 = arith.constant 0 : index
      %c0_31 = arith.constant 0 : index
      %46 = vector.load %arg5[%c0_30, %c0_31] : memref<1x128xf32, #tpu.memory_space<vmem>>, vector<1x128xf32>
      %47 = vector.broadcast %46 : vector<1x128xf32> to vector<2x128xf32>
      %48 = arith.addf %45, %47 : vector<2x128xf32>
      %49 = vector.shape_cast %48 : vector<2x128xf32> to vector<2x4x32xf32>
      %c0_32 = arith.constant 0 : index
      %c0_33 = arith.constant 0 : index
      %c0_34 = arith.constant 0 : index
      %50 = vector.load %arg8[%c0_32, %c0_33, %c0_34] : memref<2x4x32xf32, #tpu.memory_space<vmem>>, vector<2x4x32xf32>
      tpu.vector_store %arg8[%c0_32, %c0_33, %c0_34], %49 {strides = array<i32>} : memref<2x4x32xf32, #tpu.memory_space<vmem>>, vector<2x4x32xf32>,
      %cst_35 = arith.constant 0xFF800000 : f32
      %51 = vector.broadcast %cst_35 : f32 to vector<2x4xf32>
      %c0_36 = arith.constant 0 : index
      %c0_37 = arith.constant 0 : index
      %52 = vector.load %arg9[%c0_36, %c0_37] : memref<2x4xf32, #tpu.memory_space<vmem>>, vector<2x4xf32>
      tpu.vector_store %arg9[%c0_36, %c0_37], %51 {strides = array<i32>} : memref<2x4xf32, #tpu.memory_space<vmem>>, vector<2x4xf32>,
      %cst_38 = arith.constant 0.000000e+00 : f32
      %53 = vector.broadcast %cst_38 : f32 to vector<2x4xf32>
      %c0_39 = arith.constant 0 : index
      %c0_40 = arith.constant 0 : index
      %54 = vector.load %arg10[%c0_39, %c0_40] : memref<2x4xf32, #tpu.memory_space<vmem>>, vector<2x4xf32>
      tpu.vector_store %arg10[%c0_39, %c0_40], %53 {strides = array<i32>} : memref<2x4xf32, #tpu.memory_space<vmem>>, vector<2x4xf32>,
      %cst_41 = arith.constant 0.000000e+00 : f32
      %55 = vector.broadcast %cst_41 : f32 to vector<2x4x32xf32>
      %c0_42 = arith.constant 0 : index
      %c0_43 = arith.constant 0 : index
      %c0_44 = arith.constant 0 : index
      %56 = vector.load %arg11[%c0_42, %c0_43, %c0_44] : memref<2x4x32xf32, #tpu.memory_space<vmem>>, vector<2x4x32xf32>
      tpu.vector_store %arg11[%c0_42, %c0_43, %c0_44], %55 {strides = array<i32>} : memref<2x4x32xf32, #tpu.memory_space<vmem>>, vector<2x4x32xf32>,
    } else {
    }
    %c0 = arith.constant 0 : index
    %c0_1 = arith.constant 0 : index
    %c0_2 = arith.constant 0 : index
    %3 = vector.load %arg8[%c0, %c0_1, %c0_2] : memref<2x4x32xf32, #tpu.memory_space<vmem>>, vector<2x4x32xf32>
    %c0_3 = arith.constant 0 : index
    %c0_4 = arith.constant 0 : index
    %c0_5 = arith.constant 0 : index
    %4 = vector.load %arg3[%c0_3, %c0_4, %c0_5] : memref<2x8x32xbf16, #tpu.memory_space<vmem>>, vector<2x8x32xbf16>
    %5 = vector.shape_cast %3 : vector<2x4x32xf32> to vector<2x4x1x32xf32>
    %6 = vector.shape_cast %4 : vector<2x8x32xbf16> to vector<2x1x8x32xbf16>
    %7 = arith.extf %6 : vector<2x1x8x32xbf16> to vector<2x1x8x32xf32>
    %8 = vector.broadcast %5 : vector<2x4x1x32xf32> to vector<2x4x8x32xf32>
    %9 = vector.broadcast %7 : vector<2x1x8x32xf32> to vector<2x4x8x32xf32>
    %10 = arith.mulf %8, %9 : vector<2x4x8x32xf32>
    %cst = arith.constant dense<0.000000e+00> : vector<2x4x8xf32>
    %11 = vector.multi_reduction <add>, %10, %cst [3] : vector<2x4x8x32xf32> to vector<2x4x8xf32>
    %c0_6 = arith.constant 0 : index
    %c0_7 = arith.constant 0 : index
    %12 = vector.load %arg9[%c0_6, %c0_7] : memref<2x4xf32, #tpu.memory_space<vmem>>, vector<2x4xf32>
    %cst_8 = arith.constant dense<0xFF800000> : vector<2x4xf32>
    %13 = vector.multi_reduction <maximumf>, %11, %cst_8 [2] : vector<2x4x8xf32> to vector<2x4xf32>
    %14 = arith.maximumf %12, %13 : vector<2x4xf32>
    %15 = arith.subf %12, %14 : vector<2x4xf32>
    %16 = math.exp %15 : vector<2x4xf32>
    %17 = vector.shape_cast %14 : vector<2x4xf32> to vector<2x4x1xf32>
    %18 = vector.broadcast %17 : vector<2x4x1xf32> to vector<2x4x8xf32>
    %19 = arith.subf %11, %18 : vector<2x4x8xf32>
    %20 = math.exp %19 : vector<2x4x8xf32>
    %c0_9 = arith.constant 0 : index
    %c0_10 = arith.constant 0 : index
    %21 = vector.load %arg10[%c0_9, %c0_10] : memref<2x4xf32, #tpu.memory_space<vmem>>, vector<2x4xf32>
    %22 = arith.mulf %16, %21 : vector<2x4xf32>
    %cst_11 = arith.constant dense<0.000000e+00> : vector<2x4xf32>
    %23 = vector.multi_reduction <add>, %20, %cst_11 [2] : vector<2x4x8xf32> to vector<2x4xf32>
    %24 = arith.addf %22, %23 : vector<2x4xf32>
    %c0_12 = arith.constant 0 : index
    %c0_13 = arith.constant 0 : index
    %25 = vector.load %arg10[%c0_12, %c0_13] : memref<2x4xf32, #tpu.memory_space<vmem>>, vector<2x4xf32>
    tpu.vector_store %arg10[%c0_12, %c0_13], %24 {strides = array<i32>} : memref<2x4xf32, #tpu.memory_space<vmem>>, vector<2x4xf32>,
    %26 = vector.shape_cast %20 : vector<2x4x8xf32> to vector<2x4x8x1xf32>
    %27 = vector.shape_cast %4 : vector<2x8x32xbf16> to vector<2x1x8x32xbf16>
    %28 = arith.extf %27 : vector<2x1x8x32xbf16> to vector<2x1x8x32xf32>
    %29 = vector.broadcast %26 : vector<2x4x8x1xf32> to vector<2x4x8x32xf32>
    %30 = vector.broadcast %28 : vector<2x1x8x32xf32> to vector<2x4x8x32xf32>
    %31 = arith.mulf %29, %30 : vector<2x4x8x32xf32>
    %cst_14 = arith.constant dense<0.000000e+00> : vector<2x4x32xf32>
    %32 = vector.multi_reduction <add>, %31, %cst_14 [2] : vector<2x4x8x32xf32> to vector<2x4x32xf32>
    %33 = vector.shape_cast %16 : vector<2x4xf32> to vector<2x4x1xf32>
    %c0_15 = arith.constant 0 : index
    %c0_16 = arith.constant 0 : index
    %c0_17 = arith.constant 0 : index
    %34 = vector.load %arg11[%c0_15, %c0_16, %c0_17] : memref<2x4x32xf32, #tpu.memory_space<vmem>>, vector<2x4x32xf32>
    %35 = vector.broadcast %33 : vector<2x4x1xf32> to vector<2x4x32xf32>
    %36 = arith.mulf %35, %34 : vector<2x4x32xf32>
    %37 = arith.addf %36, %32 : vector<2x4x32xf32>
    %c0_18 = arith.constant 0 : index
    %c0_19 = arith.constant 0 : index
    %c0_20 = arith.constant 0 : index
    %38 = vector.load %arg11[%c0_18, %c0_19, %c0_20] : memref<2x4x32xf32, #tpu.memory_space<vmem>>, vector<2x4x32xf32>
    tpu.vector_store %arg11[%c0_18, %c0_19, %c0_20], %37 {strides = array<i32>} : memref<2x4x32xf32, #tpu.memory_space<vmem>>, vector<2x4x32xf32>,
    %c0_21 = arith.constant 0 : index
    %c0_22 = arith.constant 0 : index
    %39 = vector.load %arg9[%c0_21, %c0_22] : memref<2x4xf32, #tpu.memory_space<vmem>>, vector<2x4xf32>
    tpu.vector_store %arg9[%c0_21, %c0_22], %14 {strides = array<i32>} : memref<2x4xf32, #tpu.memory_space<vmem>>, vector<2x4xf32>,
    %c0_i32_23 = arith.constant 0 : i32
    %40 = arith.cmpi eq, %arg1, %c0_i32_23 : i32
    %41 = arith.extui %40 : i1 to i32
    %c0_i32_24 = arith.constant 0 : i32
    %42 = arith.cmpi ne, %41, %c0_i32_24 : i32
    scf.if %42 {
      %c0_25 = arith.constant 0 : index
      %c0_26 = arith.constant 0 : index
      %43 = vector.load %arg10[%c0_25, %c0_26] : memref<2x4xf32, #tpu.memory_space<vmem>>, vector<2x4xf32>
      %44 = tpu.reciprocal %43 {approx = true} : vector<2x4xf32> -> vector<2x4xf32>
      %c0_27 = arith.constant 0 : index
      %c0_28 = arith.constant 0 : index
      %c0_29 = arith.constant 0 : index
      %45 = vector.load %arg11[%c0_27, %c0_28, %c0_29] : memref<2x4x32xf32, #tpu.memory_space<vmem>>, vector<2x4x32xf32>
      %46 = vector.shape_cast %44 : vector<2x4xf32> to vector<2x4x1xf32>
      %47 = vector.broadcast %46 : vector<2x4x1xf32> to vector<2x4x32xf32>
      %48 = arith.mulf %45, %47 : vector<2x4x32xf32>
      %49 = vector.shape_cast %48 : vector<2x4x32xf32> to vector<2x128xf32>
      %50 = arith.truncf %49 : vector<2x128xf32> to vector<2x128xbf16>
      %c0_30 = arith.constant 0 : index
      %c0_31 = arith.constant 0 : index
      %51 = vector.load %arg6[%c0_30, %c0_31] : memref<128x128xbf16, #tpu.memory_space<vmem>>, vector<128x128xbf16>
      %cst_32 = arith.constant dense<0.000000e+00> : vector<2x128xf32>
      %52 = tpu.matmul %50, %51, %cst_32 {dimension_numbers = #tpu.dot_dimension_numbers<[1], [0], [0], [1], [0, 0, 1, 1], [], []>} : vector<2x128xbf16>, vector<128x128xbf16>, vector<2x128xf32> -> vector<2x128xf32>
      %c0_33 = arith.constant 0 : index
      %c0_34 = arith.constant 0 : index
      %53 = vector.load %arg7[%c0_33, %c0_34] : memref<2x128xf32, #tpu.memory_space<vmem>>, vector<2x128xf32>
      tpu.vector_store %arg7[%c0_33, %c0_34], %52 {strides = array<i32>} : memref<2x128xf32, #tpu.memory_space<vmem>>, vector<2x128xf32>,
    } else {
    }
    return
  }
  func.func @transform_0(%arg0: i32, %arg1: i32) -> (i32, i32) {
    %c0_i32 = arith.constant 0 : i32
    %c0_i32_0 = arith.constant 0 : i32
    return %arg0, %c0_i32 : i32, i32
  }
  func.func @transform_1(%arg0: i32, %arg1: i32) -> (i32, i32, i32) {
    %c0_i32 = arith.constant 0 : i32
    %c0_i32_0 = arith.constant 0 : i32
    return %arg0, %arg1, %c0_i32 : i32, i32, i32
  }
  func.func @transform_2(%arg0: i32, %arg1: i32) -> (i32, i32) {
    %c0_i32 = arith.constant 0 : i32
    %c0_i32_0 = arith.constant 0 : i32
    %c0_i32_1 = arith.constant 0 : i32
    return %c0_i32, %c0_i32_0 : i32, i32
  }
  func.func @transform_3(%arg0: i32, %arg1: i32) -> (i32, i32) {
    %c0_i32 = arith.constant 0 : i32
    %c0_i32_0 = arith.constant 0 : i32
    %c0_i32_1 = arith.constant 0 : i32
    return %c0_i32, %c0_i32_0 : i32, i32
  }
  func.func @transform_4(%arg0: i32, %arg1: i32) -> (i32, i32) {
    %c0_i32 = arith.constant 0 : i32
    %c0_i32_0 = arith.constant 0 : i32
    %c0_i32_1 = arith.constant 0 : i32
    return %c0_i32, %c0_i32_0 : i32, i32
  }
  func.func @transform_5(%arg0: i32, %arg1: i32) -> (i32, i32) {
    %c0_i32 = arith.constant 0 : i32
    %c0_i32_0 = arith.constant 0 : i32
    return %arg0, %c0_i32 : i32, i32
  }
}

</mosaic_0001>

<bundles_post_ra>
// kernel: tpu_custom_call.1
= control target key start
LH: loop header
LB: loop body
LE: loop exit
PB: predicated region body
PF: predicated region fallthrough
CT: control target
= control target key end

     0   :  { %10 = vsyncpa [#allocation7], 0  ;;  %s1412_s0 = inlined_call_operand.hbm [shape: bf16[2,32], index: 0, kind: input, shape index: {}]   ;;  %s1413_s1 = inlined_call_operand.hbm [shape: bf16[2,8,32], index: 1, kind: input, shape index: {}]   ;;  %s1414_s2 = inlined_call_operand.hbm [shape: bf16[32,128], index: 2, kind: input, shape index: {}]   ;;  %s1415_s3 = inlined_call_operand.vmem [shape: f32[1,128], index: 3, kind: input, shape index: {}]   ;;  %s1416_s4 = inlined_call_operand.hbm [shape: bf16[128,128], index: 4, kind: input, shape index: {}]   ;;  %s1417_s5 = inlined_call_operand.hbm [shape: f32[2,128], index: 5, kind: output, shape index: {}]  }
   0x1   :  { %11 = vsyncpa [#allocation10], 0 }
   0x2   :  { %12 = vsyncpa [#allocation13], 0 }
   0x3   :  { %13 = vsyncpa [#allocation8], 0  ;;  %s1102_s18 = smov [#allocation9]   ;;  %s984_s22 = scalar_lea.hbm %s1413_s1, 128 }
   0x4   :  { %s29_s19 = sshll.u32 %s1102_s18, 4  ;;  %p985_p0 = scmp.ne.s32.totalorder %s1413_s1, %s984_s22  ;;  %s30_s19 = int_to_ptr.vmem [resolvable:$true] %s29_s19 }
   0x5   :  { %p988_p1 = scmp.lt.u32.totalorder %s984_s22, %s1413_s1 }
   0x7   :  { %p990_p2 = pnand %p988_p1, %p985_p0 }
   0x9   :  { %993 = shalt.err (!%p990_p2)
}
   0xa   :  { %s994_s27 = scalar_lea.vmem %s30_s19, 128  ;;  %p999_p4 = scmp.lt.s32.totalorder %s30_s19, %s30_s19 }
   0xb   :  { %p995_p3 = scmp.ne.s32.totalorder %s30_s19, %s994_s27  ;;  %p1000_p5 = scmp.lt.s32.totalorder %s994_s27, %s994_s27 }
   0xd   :  { %p1001_p6 = por %p1000_p5, %p999_p4 }
   0xf   :  { %p1002_p7 = pnand %p1001_p6, %p995_p3 }
  0x11   :  { %1005 = shalt.err (!%p1002_p7)
}
  0x12   :  { %s1103_s28 = smov 64   ;;  %s1104_s29 = smov 4  }
  0x13   :  { %35 = dma.hbm_to_vmem [thread:$0]  %s1413_s1, 128, %s30_s19, [#allocation10], %s1103_s28, %s1103_s28, %s1104_s29  }
  0x14   :  { %s1105_s7 = smov [#allocation6]   ;;  %s1106_s9 = smov [#allocation11]  }
  0x15   :  { %s20_s8 = sshll.u32 %s1105_s7, 4  ;;  %s41_s10 = sshll.u32 %s1106_s9, 4  ;;  %s21_s8 = int_to_ptr.vmem [resolvable:$true] %s20_s8  ;;  %s42_s10 = int_to_ptr.vmem [resolvable:$true] %s41_s10 }
  0x16   :  { %s1006_s13 = scalar_lea.hbm %s1412_s0, 16 }
  0x17   :  { %p1007_p8 = scmp.ne.s32.totalorder %s1412_s0, %s1006_s13  ;;  %p1010_p9 = scmp.lt.u32.totalorder %s1006_s13, %s1412_s0 }
  0x19   :  { %p1012_p10 = pnand %p1010_p9, %p1007_p8 }
  0x1b   :  { %1015 = shalt.err (!%p1012_p10)
}
  0x1c   :  { %s1016_s1 = scalar_lea.vmem %s21_s8, 16  ;;  %s1020_s18 = scalar_lea.vmem %s21_s8, 32 }
  0x1d   :  { %p1017_p11 = scmp.ne.s32.totalorder %s21_s8, %s1016_s1  ;;  %p1021_p12 = scmp.lt.s32.totalorder %s21_s8, %s21_s8 }
  0x1e   :  { %p1022_p13 = scmp.lt.s32.totalorder %s1020_s18, %s1016_s1 }
  0x20   :  { %p1023_p0 = por %p1022_p13, %p1021_p12 }
  0x22   :  { %p1024_p1 = pnand %p1023_p0, %p1017_p11 }
  0x24   :  { %1027 = shalt.err (!%p1024_p1)
}
  0x25   :  { %23 = dma.hbm_to_vmem [thread:$0]  %s1412_s0, 16, %s21_s8, [#allocation7]  }
  0x26   :  { %s1028_s23 = scalar_lea.hbm %s1414_s2, 256 }
  0x27   :  { %p1029_p2 = scmp.ne.s32.totalorder %s1414_s2, %s1028_s23  ;;  %p1032_p3 = scmp.lt.u32.totalorder %s1028_s23, %s1414_s2 }
  0x29   :  { %p1034_p4 = pnand %p1032_p3, %p1029_p2 }
  0x2b   :  { %1037 = shalt.err (!%p1034_p4)
}
  0x2c   :  { %s1038_s30 = scalar_lea.vmem %s42_s10, 256  ;;  %p1043_p6 = scmp.lt.s32.totalorder %s42_s10, %s42_s10 }
  0x2d   :  { %p1039_p5 = scmp.ne.s32.totalorder %s42_s10, %s1038_s30  ;;  %p1044_p7 = scmp.lt.s32.totalorder %s1038_s30, %s1038_s30 }
  0x2f   :  { %p1045_p8 = por %p1044_p7, %p1043_p6 }
  0x31   :  { %p1046_p9 = pnand %p1045_p8, %p1039_p5 }
  0x33   :  { %1049 = shalt.err (!%p1046_p9)
}
  0x34   :  { %47 = dma.hbm_to_vmem [thread:$0]  %s1414_s2, 256, %s42_s10, [#allocation10], %s1103_s28, %s1103_s28, %s1104_s29  }
  0x35   :  { %s1107_s7 = smov [#allocation12]   ;;  %s1050_s12 = scalar_lea.hbm %s1416_s4, 1024 }
  0x36   :  { %s55_s8 = sshll.u32 %s1107_s7, 4  ;;  %p1051_p10 = scmp.ne.s32.totalorder %s1416_s4, %s1050_s12  ;;  %s56_s8 = int_to_ptr.vmem [resolvable:$true] %s55_s8 }
  0x37   :  { %p1054_p11 = scmp.lt.u32.totalorder %s1050_s12, %s1416_s4 }
  0x39   :  { %p1056_p12 = pnand %p1054_p11, %p1051_p10 }
  0x3b   :  { %1059 = shalt.err (!%p1056_p12)
}
  0x3c   :  { %s1060_s17 = scalar_lea.vmem %s56_s8, 1024  ;;  %p1065_p0 = scmp.lt.s32.totalorder %s56_s8, %s56_s8 }
  0x3d   :  { %p1061_p13 = scmp.ne.s32.totalorder %s56_s8, %s1060_s17  ;;  %p1066_p1 = scmp.lt.s32.totalorder %s1060_s17, %s1060_s17 }
  0x3f   :  { %p1067_p2 = por %p1066_p1, %p1065_p0 }
  0x41   :  { %p1068_p3 = pnand %p1067_p2, %p1061_p13 }
  0x43   :  { %1071 = shalt.err (!%p1068_p3)
}
  0x44   :  { %61 = dma.hbm_to_vmem [thread:$0]  %s1416_s4, 1024, %s56_s8, [#allocation13], %s1103_s28, %s1103_s28, %s1104_s29  }
  0x45   :  { %1094 = dma.done.wait [#allocation7], 16  }
  0x46   :  { %1095 = vsyncadd [#allocation7], 4294967280 }
  0x47   :  { %1096 = dma.done.wait [#allocation10], 384  }
  0x48   :  { %1097 = vsyncadd [#allocation10], 4294966912 }
  0x49   :  { %1098 = dma.done.wait [#allocation13], 1024  }
  0x4a   :  { %1099 = vsyncadd [#allocation13], 4294966272  ;;  %v1108_v0 = vmov 0.0   ;;  %vm1109_vm0 = vmmov 0   ;;  %v954_v1 = vld [vmem:[#allocation11] sm:$0xff]   ;;  %v955_v2 = vld [vmem:[#allocation11 + $0x8] sm:$0xff]   ;;  %v161_v12 = vlaneseq }
  0x4b   :  { %908 = vmatprep.subr.bf16.mxu0 %v1108_v0  ;;  %912 = vmatprep.mubr.msk.bf16.mxu0 %vm1109_vm0, %v1108_v0  ;;  %vm103_vm1 = vcmask 261120   ;;  %v79_v3 = vld [vmem:[#allocation6] sm:$0x1]  ;;  %vm182_vm2 = vcmask 257024   ;;  %v878_v4 = vld [vmem:[%s1415_s3] ss:$0 sm:$0xff] }
  0x4c   :  { %916 = vmatprep.subr.bf16.mxu1 %v1108_v0  ;;  %932 = vmatprep.mubr.msk.bf16.mxu1 %vm1109_vm0, %v1108_v0  ;;  %188 = vst.msk [vmem:[#allocation5] sm:$0xf] %vm182_vm2, %v1108_v0  ;;  %189 = vst.msk [vmem:[#allocation5 + $0x4] sm:$0xf] %vm182_vm2, %v1108_v0  ;;  %s1110_s1 = smov 32   ;;  %s1111_s18 = smov 96  }
  0x4d   :  { %909 = vmatpush3.bf16.msra.mxu0 %v954_v1  ;;  %v1112_v10 = vmov 1983009808   ;;  %v1222_v14 = vshrl.u32 %v161_v12, 7  ;;  %v1113_v15 = vmov 1934713408   ;;  %v893_v34 = vld [vmem:[#allocation9] sm:$0xff]  }
  0x4e   :  { %910 = vmatprep.subr.bf16.mxu0 %v1108_v0  ;;  %v159_v11 = vunpack.c.l.s4 %v1112_v10  ;;  %v175_v16 = vunpack.c.l.s4 %v1113_v15  ;;  %v1114_v28 = vmov 1966171168   ;;  %v1240_v37 = vunpack.c.l.bf16 %v893_v34  ;;  %s1117_s3 = smov [#allocation14]  }
  0x4f   :  { %v205_v29 = vunpack.c.l.s4 %v1114_v28  ;;  %v1238_v35 = vsub.s32 0, %v1222_v14  ;;  %v1243_v45 = vunpack.c.h.bf16 %v893_v34  ;;  %vm362_vm3 = vcmask 1041409  }
  0x50   :  { %v160_v13 = vunpack.c.0.s8 %v159_v11  ;;  %v176_v21 = vunpack.c.0.s8 %v175_v16  ;;  %vm364_vm4 = vcmask 1042434   ;;  %vm366_vm5 = vcmask 1043459  }
  0x51   :  { %911 = vmatpush3.bf16.msra.mxu0 %v955_v2  ;;  %v206_v32 = vunpack.c.0.s8 %v205_v29  ;;  %vm373_vm6 = vcmask 60416   ;;  %vm185_vm7 = vcmask 25600   ;;  %vm751_vm8 = vcmask 523264  }
  0x52   :  { %v1225_v19 = vsub.s32 %v160_v13, %v1222_v14  ;;  %v1229_v25 = vsub.s32 %v176_v21, %v1222_v14  ;;  %v329_v13 = vand.u32 127, %v161_v12  ;;  %187 = vst.msk [vmem:[#allocation4] sm:$0x3] %vm185_vm7, %v1108_v0  ;;  %vm753_vm9 = vcmask 785408  }
  0x53   :  { %v209_v33 = vsub.s32 %v206_v32, %v1222_v14 }
  0x54   :  { %913 = vmatmul.mubr.msk.bf16.vlgmr.msra.gmra.mrb[0].mxu0 %vm103_vm1, %v79_v3 }
 0x127   :  { %v141_v5 = vpop.f32.mrb[0].mxu0 }
 0x128   :  { %v142_v6 = vadd.f32 %v878_v4, %v141_v5  ;;  %v914_v7 = vpop.f32.mrb[1].mxu0 }
 0x129   :  { %v144_v8 = vpop.f32.mrb[2].mxu0 }
 0x12a   :  { %154 = vrot.lane.b32.xlu1 %v142_v6, %s1110_s1  ;;  %148 = vrot.lane.b32.xlu0 %v142_v6, %s1111_s18  ;;  %v915_v9 = vpop.f32.mrb[3].mxu0 }
 0x12e   :  { %151 = vrot.lane.b32.xlu0 %v142_v6, %s1103_s28 }
 0x19c   :  { %v155_v17 = vpop.permute.xlu1 %154  ;;  %v149_v18 = vpop.permute.xlu0 %148 }
 0x19d   :  { %v165_v20 = vcombine.low %v149_v18, %v155_v17  ;;  %v1272_v17 = vsub.s32 %v329_v13, %v1222_v14 }
 0x19f   :  { %v172_v24 = vrot.slane %v165_v20, %v1225_v19 }
 0x1a0   :  { %v152_v22 = vpop.permute.xlu0 %151 }
 0x1a1   :  { %v157_v23 = vcombine.low %v142_v6, %v152_v22 }
 0x1a3   :  { %v164_v26 = vrot.slane %v157_v23, %v1225_v19 }
 0x1a5   :  { %v173_v27 = vcombine.low %v164_v26, %v172_v24 }
 0x1a7   :  { %v180_v30 = vrot.slane %v173_v27, %v1229_v25 }
 0x1a9   :  { %v181_v31 = vcombine.high %v180_v30, %v1108_v0  ;;  %183 = vst.msk [vmem:[#allocation2] sm:$0xf] %vm182_vm2, %v180_v30 }
 0x1ab   :  { %184 = vst.msk [vmem:[#allocation2 + $0x4] sm:$0xf] %vm182_vm2, %v181_v31 }
 0x1b0   :  { %v882_v36 = vld.sshfl [vmem:[#allocation2] sm:$0x33 pattern:$0x75316420] }
 0x1b1   :  { %v210_v38 = vrot.slane %v882_v36, %v209_v33  ;;  %v203_v39 = vcombine.high %v882_v36, %v882_v36 }
 0x1b2   :  { %v883_v40 = vld.sshfl [vmem:[#allocation2 + $0x4] sm:$0x33 pattern:$0x75316420] }
 0x1b3   :  { %v249_v41 = vrot.slane %v210_v38, %v1238_v35  ;;  %v217_v42 = vrot.slane %v203_v39, %v209_v33  ;;  %v227_v43 = vcombine.high %v883_v40, %v883_v40  ;;  %v234_v44 = vrot.slane %v883_v40, %v209_v33 }
 0x1b4   :  { %v218_v46 = vcombine.high %v210_v38, %v210_v38 }
 0x1b5   :  { %v286_v47 = vmul.f32 %v1240_v37, %v249_v41  ;;  %v253_v48 = vrot.slane %v217_v42, %v1238_v35  ;;  %v241_v49 = vrot.slane %v227_v43, %v209_v33  ;;  %v265_v50 = vrot.slane %v234_v44, %v1238_v35 }
 0x1b6   :  { %v242_v51 = vcombine.high %v234_v44, %v234_v44  ;;  %v257_v56 = vrot.slane %v218_v46, %v1238_v35  ;;  %v219_v61 = vcombine.high %v217_v42, %v217_v42  ;;  %v1115_v42 = vmov -inf  }
 0x1b7   :  { %v295_v52 = vsel %vm103_vm1, %v286_v47, 0.0  ;;  %v287_v53 = vmul.f32 %v1240_v37, %v253_v48  ;;  %v269_v54 = vrot.slane %v241_v49, %v1238_v35  ;;  %v243_v57 = vcombine.high %v241_v49, %v241_v49  ;;  %186 = vst.msk [vmem:[#allocation3] sm:$0x3] %vm185_vm7, %v1115_v42 }
 0x1b8   :  { %296 = vadd.xlane.f32.xlu1 %v295_v52  ;;  %v273_v55 = vrot.slane %v242_v51, %v1238_v35  ;;  %v290_v60 = vmul.f32 %v1243_v45, %v265_v50  ;;  %v288_v3 = vmul.f32 %v1240_v37, %v257_v56  ;;  %v261_v4 = vrot.slane %v219_v61, %v1238_v35 }
 0x1b9   :  { %v298_v58 = vsel %vm103_vm1, %v287_v53, 0.0  ;;  %v291_v59 = vmul.f32 %v1243_v45, %v269_v54  ;;  %v277_v1 = vrot.slane %v243_v57, %v1238_v35  ;;  %v1308_v49 = vsub.s32 1, %v1222_v14 }
 0x1ba   :  { %299 = vadd.xlane.f32.xlu0 %v298_v58  ;;  %v292_v63 = vmul.f32 %v1243_v45, %v273_v55  ;;  %v307_v2 = vsel %vm103_vm1, %v290_v60, 0.0  ;;  %v301_v7 = vsel %vm103_vm1, %v288_v3, 0.0  ;;  %v289_v8 = vmul.f32 %v1240_v37, %v261_v4 }
 0x1bb   :  { %v310_v62 = vsel %vm103_vm1, %v291_v59, 0.0  ;;  %v293_v6 = vmul.f32 %v1243_v45, %v277_v1  ;;  %v1116_v55 = vmov 0   ;;  %v422_v56 = vsub.s32 2, %v1222_v14 }
 0x1bc   :  { %311 = vadd.xlane.f32.xlu1 %v310_v62  ;;  %v313_v5 = vsel %vm103_vm1, %v292_v63, 0.0  ;;  %v304_v10 = vsel %vm103_vm1, %v289_v8, 0.0  ;;  %953 = vset.pattern.permute.xlu0 %v1116_v55  ;;  %v426_v62 = vsub.s32 3, %v1222_v14 }
 0x1bd   :  { %v316_v9 = vsel %vm103_vm1, %v293_v6, 0.0  ;;  %952 = vset.pattern.permute.xlu1 %v1116_v55 }
 0x1be   :  { %308 = vadd.xlane.f32.xlu0 %v307_v2  ;;  %v1304_v47 = vld [vmem:[#allocation3] sm:$0x3] }
 0x1c0   :  { %314 = vadd.xlane.f32.xlu1 %v313_v5 }
 0x1c2   :  { %302 = vadd.xlane.f32.xlu0 %v301_v7 }
 0x1c4   :  { %317 = vadd.xlane.f32.xlu1 %v316_v9 }
 0x1c6   :  { %305 = vadd.xlane.f32.xlu0 %v304_v10 }
 0x245   :  { %v297_v11 = vpop.xlane.xlu1 %296 }
 0x246   :  { %v333_v29 = vrot.slane %v297_v11, %v1272_v17 }
 0x247   :  { %v300_v15 = vpop.xlane.xlu0 %299 }
 0x248   :  { %v337_v12 = vrot.slane %v300_v15, %v1272_v17 }
 0x249   :  { %v1269_v16 = vpop.xlane.xlu1 %311 }
 0x24a   :  { %v353_v22 = vrot.slane %v1269_v16, %v1272_v17  ;;  %v363_v36 = vsel %vm362_vm3, %v337_v12, %v333_v29 }
 0x24b   :  { %v309_v18 = vpop.xlane.xlu0 %308 }
 0x24c   :  { %v349_v20 = vrot.slane %v309_v18, %v1272_v17 }
 0x24d   :  { %v1275_v21 = vpop.xlane.xlu1 %314 }
 0x24e   :  { %v357_v23 = vrot.slane %v1275_v21, %v1272_v17  ;;  %v368_v26 = vsel %vm362_vm3, %v353_v22, %v349_v20 }
 0x24f   :  { %v1281_v24 = vpop.xlane.xlu0 %302 }
 0x250   :  { %v341_v27 = vrot.slane %v1281_v24, %v1272_v17  ;;  %v369_v32 = vsel %vm364_vm4, %v357_v23, %v368_v26 }
 0x251   :  { %v1287_v28 = vpop.xlane.xlu1 %317 }
 0x252   :  { %v361_v30 = vrot.slane %v1287_v28, %v1272_v17  ;;  %v365_v39 = vsel %vm364_vm4, %v341_v27, %v363_v36 }
 0x253   :  { %v306_v31 = vpop.xlane.xlu0 %305 }
 0x254   :  { %v345_v33 = vrot.slane %v306_v31, %v1272_v17  ;;  %v370_v34 = vsel %vm366_vm5, %v361_v30, %v369_v32 }
 0x255   :  { %v377_v38 = vsel %vm373_vm6, %v370_v34, -inf }
 0x256   :  { %378 = vmax.xlane.f32.xlu1 %v377_v38  ;;  %v367_v40 = vsel %vm366_vm5, %v345_v33, %v365_v39 }
 0x257   :  { %v374_v41 = vsel %vm373_vm6, %v367_v40, -inf }
 0x258   :  { %375 = vmax.xlane.f32.xlu0 %v374_v41 }
 0x2e3   :  { %v379_v43 = vpop.xlane.xlu1 %378 }
 0x2e4   :  { %v389_v46 = vrot.slane %v379_v43, %v1272_v17 }
 0x2e5   :  { %v376_v44 = vpop.xlane.xlu0 %375 }
 0x2e6   :  { %v385_v48 = vrot.slane %v376_v44, %v1272_v17 }
 0x2e8   :  { %v390_v50 = vsel %vm362_vm3, %v389_v46, %v385_v48 }
 0x2e9   :  { %v1312_v51 = vmax.f32 %v1304_v47, %v390_v50 }
 0x2eb   :  { %v393_v52 = vsub.f32 %v1304_v47, %v1312_v51  ;;  %682 = vst.msk [vmem:[#allocation3] sm:$0x3] %vm185_vm7, %v1312_v51  ;;  %v406_v53 = vrot.slane %v1312_v51, %v1308_v49  ;;  %v399_v54 = vrot.slane %v1312_v51, %v1238_v35 }
 0x2ed   :  { %408 = vbcast.lane.b32.xlu1 %v406_v53, 256  ;;  %401 = vbcast.lane.b32.xlu0 %v399_v54, 256 }
 0x35f   :  { %v409_v57 = vpop.permute.xlu1 %408  ;;  %v402_v58 = vpop.permute.xlu0 %401 }
 0x360   :  { %v415_v59 = vrot.slane %v402_v58, %v1238_v35  ;;  %v419_v60 = vrot.slane %v402_v58, %v1308_v49  ;;  %v431_v61 = vrot.slane %v409_v57, %v1238_v35  ;;  %v423_v63 = vrot.slane %v402_v58, %v422_v56 }
 0x361   :  { %v435_v3 = vrot.slane %v409_v57, %v1308_v49  ;;  %v427_v6 = vrot.slane %v402_v58, %v426_v62  ;;  %v439_v9 = vrot.slane %v409_v57, %v422_v56  ;;  %v443_v14 = vrot.slane %v409_v57, %v426_v62 }
 0x362   :  { %v452_v1 = vsub.f32 %v297_v11, %v415_v59  ;;  %v453_v2 = vsub.f32 %v300_v15, %v419_v60  ;;  %v456_v4 = vsub.f32 %v309_v18, %v431_v61  ;;  %v454_v7 = vsub.f32 %v1281_v24, %v423_v63 }
 0x363   :  { %v457_v10 = vsub.f32 %v1269_v16, %v435_v3  ;;  %v455_v20 = vsub.f32 %v306_v31, %v427_v6  ;;  %v458_v11 = vsub.f32 %v1275_v21, %v439_v9  ;;  %v459_v23 = vsub.f32 %v1287_v28, %v443_v14 }
 0x364   :  { %v460_v5 = vmul.f32 1.442695, %v452_v1  ;;  %v462_v8 = vmul.f32 1.442695, %v453_v2  ;;  %v468_v13 = vmul.f32 1.442695, %v456_v4 }
 0x365   :  { %v464_v22 = vmul.f32 1.442695, %v454_v7  ;;  %v470_v15 = vmul.f32 1.442695, %v457_v10  ;;  %v466_v18 = vmul.f32 1.442695, %v455_v20 }
 0x366   :  { %964 = vpow2.f32 %v460_v5  ;;  %v472_v24 = vmul.f32 1.442695, %v458_v11  ;;  %v474_v16 = vmul.f32 1.442695, %v459_v23 }
 0x367   :  { %966 = vpow2.f32 %v462_v8 }
 0x368   :  { %968 = vpow2.f32 %v468_v13 }
 0x369   :  { %970 = vpow2.f32 %v464_v22 }
 0x36a   :  { %972 = vpow2.f32 %v470_v15 }
 0x36b   :  { %974 = vpow2.f32 %v466_v18 }
 0x36c   :  { %976 = vpow2.f32 %v472_v24 }
 0x36d   :  { %978 = vpow2.f32 %v474_v16 }
 0x370   :  { %v965_v12 = vpop.eup %964 }
 0x371   :  { %v967_v26 = vpop.eup %966  ;;  %487 = vperm.xlu1 %952, %v965_v12  }
 0x372   :  { %490 = vperm.xlu0 %953, %v967_v26   ;;  %v969_v27 = vpop.eup %968 }
 0x373   :  { %v971_v29 = vpop.eup %970 }
 0x374   :  { %v973_v21 = vpop.eup %972 }
 0x375   :  { %499 = vperm.xlu1 %952, %v969_v27   ;;  %v975_v30 = vpop.eup %974 }
 0x376   :  { %493 = vperm.xlu0 %953, %v971_v29   ;;  %v977_v31 = vpop.eup %976 }
 0x377   :  { %v979_v28 = vpop.eup %978 }
 0x379   :  { %502 = vperm.xlu1 %952, %v973_v21  }
 0x37a   :  { %496 = vperm.xlu0 %953, %v975_v30  }
 0x37d   :  { %505 = vperm.xlu1 %952, %v977_v31  }
 0x381   :  { %508 = vperm.xlu1 %952, %v979_v28  }
 0x3f0   :  { %v488_v32 = vpop.permute.xlu1 %487 }
 0x3f1   :  { %v491_v33 = vpop.permute.xlu0 %490  ;;  %v579_v34 = vmul.f32 %v1240_v37, %v488_v32  ;;  %v513_v53 = vrot.slane %v488_v32, %v1272_v17 }
 0x3f2   :  { %v580_v36 = vmul.f32 %v1240_v37, %v491_v33  ;;  %v517_v55 = vrot.slane %v491_v33, %v1272_v17 }
 0x3f3   :  { %v587_v38 = vsel %vm103_vm1, %v579_v34, 0.0 }
 0x3f4   :  { %v594_v39 = vsel %vm103_vm1, %v580_v36, 0.0  ;;  %v588_v40 = vrot.slane %v587_v38, 4  ;;  %v500_v41 = vpop.permute.xlu1 %499  ;;  %v542_v20 = vsel %vm362_vm3, %v517_v55, %v513_v53 }
 0x3f5   :  { %v595_v42 = vrot.slane %v594_v39, 4  ;;  %v494_v43 = vpop.permute.xlu0 %493  ;;  %v583_v44 = vmul.f32 %v1243_v45, %v500_v41  ;;  %v529_v27 = vrot.slane %v500_v41, %v1272_v17 }
 0x3f6   :  { %v589_v46 = vadd.f32 %v588_v40, %v587_v38  ;;  %v581_v48 = vmul.f32 %v1240_v37, %v494_v43  ;;  %v521_v61 = vrot.slane %v494_v43, %v1272_v17 }
 0x3f7   :  { %v596_v50 = vadd.f32 %v595_v42, %v594_v39  ;;  %v615_v54 = vsel %vm103_vm1, %v583_v44, 0.0  ;;  %v394_v42 = vmul.f32 1.442695, %v393_v52 }
 0x3f8   :  { %v590_v56 = vrot.slane %v589_v46, 2  ;;  %v601_v57 = vsel %vm103_vm1, %v581_v48, 0.0  ;;  %v616_v58 = vrot.slane %v615_v54, 4  ;;  %v503_v59 = vpop.permute.xlu1 %502  ;;  %v543_v15 = vsel %vm364_vm4, %v521_v61, %v542_v20 }
 0x3f9   :  { %v597_v60 = vrot.slane %v596_v50, 2  ;;  %v602_v62 = vrot.slane %v601_v57, 4  ;;  %v497_v63 = vpop.permute.xlu0 %496  ;;  %v584_v1 = vmul.f32 %v1243_v45, %v503_v59  ;;  %v533_v11 = vrot.slane %v503_v59, %v1272_v17 }
 0x3fa   :  { %v591_v2 = vadd.f32 %v590_v56, %v589_v46  ;;  %v617_v3 = vadd.f32 %v616_v58, %v615_v54  ;;  %v525_v6 = vrot.slane %v497_v63, %v1272_v17  ;;  %980 = vpow2.f32 %v394_v42  ;;  %v958_v42 = vld [vmem:[#allocation12 + $0x10] sm:$0xff]  }
 0x3fb   :  { %v598_v4 = vadd.f32 %v597_v60, %v596_v50  ;;  %v603_v5 = vadd.f32 %v602_v62, %v601_v57  ;;  %v622_v7 = vsel %vm103_vm1, %v584_v1, 0.0  ;;  %v545_v38 = vsel %vm362_vm3, %v533_v11, %v529_v27 }
 0x3fc   :  { %v592_v8 = vrot.slane %v591_v2, 1  ;;  %v618_v9 = vrot.slane %v617_v3, 2  ;;  %v623_v10 = vrot.slane %v622_v7, 4  ;;  %v506_v13 = vpop.permute.xlu1 %505  ;;  %v544_v29 = vsel %vm366_vm5, %v525_v6, %v543_v15 }
 0x3fd   :  { %v599_v22 = vrot.slane %v598_v4, 1  ;;  %v604_v14 = vrot.slane %v603_v5, 2  ;;  %v537_v24 = vrot.slane %v506_v13, %v1272_v17  ;;  %v585_v12 = vmul.f32 %v1243_v45, %v506_v13 }
 0x3fe   :  { %v619_v18 = vadd.f32 %v618_v9, %v617_v3  ;;  %v624_v23 = vadd.f32 %v623_v10, %v622_v7  ;;  %v593_v26 = vadd.f32 %v592_v8, %v591_v2  ;;  %v550_v28 = vsel %vm373_vm6, %v544_v29, 0.0  ;;  %v658_v29 = vld [vmem:[#allocation5 + $0x4] sm:$0xf] }
 0x3ff   :  { %v605_v16 = vadd.f32 %v604_v14, %v603_v5  ;;  %v600_v21 = vadd.f32 %v599_v22, %v598_v4  ;;  %v629_v31 = vsel %vm103_vm1, %v585_v12, 0.0  ;;  %551 = vadd.xlane.f32.xlu0 %v550_v28  ;;  %v546_v41 = vsel %vm364_vm4, %v537_v24, %v545_v38 }
 0x400   :  { %v625_v30 = vrot.slane %v624_v23, 2  ;;  %v509_v32 = vpop.permute.xlu1 %508  ;;  %v630_v34 = vrot.slane %v629_v31, 4  ;;  %v620_v39 = vrot.slane %v619_v18, 1  ;;  %v582_v1 = vmul.f32 %v1240_v37, %v497_v63  ;;  %v476_v37 = vld [vmem:[#allocation4] sm:$0x3] }
 0x401   :  { %v606_v33 = vrot.slane %v605_v16, 1  ;;  %v541_v36 = vrot.slane %v509_v32, %v1272_v17  ;;  %v669_v53 = vsel %vm362_vm3, %v600_v21, %v593_v26  ;;  %v586_v3 = vmul.f32 %v1243_v45, %v509_v32 }
 0x402   :  { %v626_v40 = vadd.f32 %v625_v30, %v624_v23  ;;  %v631_v44 = vadd.f32 %v630_v34, %v629_v31  ;;  %v621_v56 = vadd.f32 %v620_v39, %v619_v18  ;;  %v608_v2 = vsel %vm103_vm1, %v582_v1, 0.0  ;;  %v657_v18 = vld [vmem:[#allocation5] sm:$0xf] }
 0x403   :  { %v607_v43 = vadd.f32 %v606_v33, %v605_v16  ;;  %v547_v46 = vsel %vm366_vm5, %v541_v36, %v546_v41  ;;  %v609_v4 = vrot.slane %v608_v2, 4  ;;  %v636_v5 = vsel %vm103_vm1, %v586_v3, 0.0  ;;  %v957_v41 = vld [vmem:[#allocation12 + $0x8] sm:$0xff]  }
 0x404   :  { %v627_v48 = vrot.slane %v626_v40, 1  ;;  %v553_v50 = vsel %vm373_vm6, %v547_v46, 0.0  ;;  %v632_v54 = vrot.slane %v631_v44, 2  ;;  %v981_v60 = vpop.eup %980  ;;  %v637_v7 = vrot.slane %v636_v5, 4 }
 0x405   :  { %554 = vadd.xlane.f32.xlu1 %v553_v50  ;;  %v670_v55 = vsel %vm364_vm4, %v607_v43, %v669_v53  ;;  %v653_v61 = vrot.slane %v981_v60, %v1308_v49  ;;  %v646_v62 = vrot.slane %v981_v60, %v1238_v35  ;;  %v610_v6 = vadd.f32 %v609_v4, %v608_v2  ;;  %v959_v43 = vld [vmem:[#allocation12 + $0x18] sm:$0xff]  }
 0x406   :  { %v628_v57 = vadd.f32 %v627_v48, %v626_v40  ;;  %v633_v58 = vadd.f32 %v632_v54, %v631_v44  ;;  %v638_v9 = vadd.f32 %v637_v7, %v636_v5  ;;  %v477_v16 = vmul.f32 %v981_v60, %v476_v37  ;;  %v956_v40 = vld [vmem:[#allocation12] sm:$0xff]  }
 0x407   :  { %v611_v8 = vrot.slane %v610_v6, 2  ;;  %917 = vmatpush3.bf16.msra.mxu1 %v956_v40  ;;  %v960_v44 = vld [vmem:[#allocation12 + $0x20] sm:$0xff]  }
 0x408   :  { %v672_v47 = vsel %vm362_vm3, %v628_v57, %v621_v56  ;;  %v634_v51 = vrot.slane %v633_v58, 1  ;;  %v639_v13 = vrot.slane %v638_v9, 2  ;;  %918 = vmatprep.subr.bf16.mxu1 %v1108_v0 }
 0x409   :  { %v612_v10 = vadd.f32 %v611_v8, %v610_v6 }
 0x40a   :  { %v635_v52 = vadd.f32 %v634_v51, %v633_v58  ;;  %v640_v22 = vadd.f32 %v639_v13, %v638_v9  ;;  %v963_v58 = vld [vmem:[#allocation12 + $0x38] sm:$0xff]  }
 0x40b   :  { %v613_v20 = vrot.slane %v612_v10, 1  ;;  %919 = vmatpush3.bf16.msra.mxu1 %v957_v41 }
 0x40c   :  { %v673_v59 = vsel %vm364_vm4, %v635_v52, %v672_v47  ;;  %v641_v11 = vrot.slane %v640_v22, 1  ;;  %920 = vmatprep.subr.bf16.mxu1 %v1108_v0 }
 0x40d   :  { %v614_v15 = vadd.f32 %v613_v20, %v612_v10 }
 0x40e   :  { %v642_v27 = vadd.f32 %v641_v11, %v640_v22 }
 0x40f   :  { %v671_v26 = vsel %vm366_vm5, %v614_v15, %v670_v55  ;;  %921 = vmatpush3.bf16.msra.mxu1 %v958_v42 }
 0x410   :  { %v674_v33 = vsel %vm366_vm5, %v642_v27, %v673_v59  ;;  %922 = vmatprep.subr.bf16.mxu1 %v1108_v0 }
 0x413   :  { %923 = vmatpush3.bf16.msra.mxu1 %v959_v43 }
 0x414   :  { %924 = vmatprep.subr.bf16.mxu1 %v1108_v0 }
 0x415   :  { %648 = vbcast.lane.b32.xlu0 %v646_v62, 256 }
 0x416   :  { %655 = vbcast.lane.b32.xlu1 %v653_v61, 256 }
 0x417   :  { %925 = vmatpush3.bf16.msra.mxu1 %v960_v44 }
 0x418   :  { %926 = vmatprep.subr.bf16.mxu1 %v1108_v0 }
 0x48c   :  { %v552_v14 = vpop.xlane.xlu0 %551 }
 0x48d   :  { %v561_v45 = vrot.slane %v552_v14, %v1272_v17 }
 0x490   :  { %v649_v63 = vpop.permute.xlu0 %648 }
 0x491   :  { %v659_v24 = vmul.f32 %v657_v18, %v649_v63 }
 0x492   :  { %v555_v23 = vpop.xlane.xlu1 %554 }
 0x493   :  { %v565_v12 = vrot.slane %v555_v23, %v1272_v17  ;;  %v677_v21 = vadd.f32 %v671_v26, %v659_v24 }
 0x495   :  { %v566_v30 = vsel %vm362_vm3, %v565_v12, %v561_v45  ;;  %680 = vst.msk [vmem:[#allocation5] sm:$0xf] %vm182_vm2, %v677_v21 }
 0x496   :  { %v568_v31 = vadd.f32 %v566_v30, %v477_v16  ;;  %v656_v28 = vpop.permute.xlu1 %655 }
 0x497   :  { %v660_v32 = vmul.f32 %v658_v29, %v656_v28 }
 0x498   :  { %570 = vst.msk [vmem:[#allocation4] sm:$0x3] %vm185_vm7, %v568_v31 }
 0x499   :  { %v678_v34 = vadd.f32 %v674_v33, %v660_v32 }
 0x49b   :  { %681 = vst.msk [vmem:[#allocation5 + $0x4] sm:$0xf] %vm182_vm2, %v678_v34 }
 0x49c   :  { %v688_v50 = vld [vmem:[#allocation5] sm:$0xf] }
 0x49f   :  { %v686_v17 = vld [vmem:[#allocation4] sm:$0x3] }
 0x4a0   :  { %982 = vrcp.f32 %v686_v17 }
 0x4a2   :  { %v689_v46 = vld [vmem:[#allocation5 + $0x4] sm:$0xf] }
 0x4aa   :  { %v983_v36 = vpop.eup %982 }
 0x4ab   :  { %v700_v38 = vrot.slane %v983_v36, %v1308_v49  ;;  %v693_v39 = vrot.slane %v983_v36, %v1238_v35  ;;  %v961_v35 = vld [vmem:[#allocation12 + $0x28] sm:$0xff]   ;;  %v962_v49 = vld [vmem:[#allocation12 + $0x30] sm:$0xff]  }
 0x4ac   :  { %927 = vmatpush3.bf16.msra.mxu1 %v961_v35 }
 0x4ad   :  { %702 = vbcast.lane.b32.xlu1 %v700_v38, 256  ;;  %695 = vbcast.lane.b32.xlu0 %v693_v39, 256 }
 0x4ae   :  { %928 = vmatprep.subr.bf16.mxu1 %v1108_v0 }
 0x4b0   :  { %929 = vmatpush3.bf16.msra.mxu1 %v962_v49 }
 0x4b1   :  { %930 = vmatprep.subr.bf16.mxu1 %v1108_v0 }
 0x4b4   :  { %931 = vmatpush3.bf16.msra.mxu1 %v963_v58 }
 0x51f   :  { %v703_v48 = vpop.permute.xlu1 %702  ;;  %v696_v53 = vpop.permute.xlu0 %695 }
 0x520   :  { %v712_v54 = vmul.f32 %v703_v48, %v689_v46  ;;  %v704_v55 = vmul.f32 %v696_v53, %v688_v50 }
 0x522   :  { %v719_v56 = vrot.slane %v712_v54, %v1225_v19  ;;  %v711_v57 = vrot.slane %v704_v55, %v1225_v19 }
 0x524   :  { %v720_v47 = vcombine.low %v711_v57, %v719_v56  ;;  %v721_v51 = vcombine.high %v711_v57, %v719_v56 }
 0x526   :  { %v735_v52 = vrot.slane %v721_v51, %v1229_v25  ;;  %v728_v59 = vrot.slane %v720_v47, %v1229_v25 }
 0x528   :  { %743 = vrot.lane.b32.xlu1 %v735_v52, %s1103_s28  ;;  %v736_v60 = vcombine.high %v728_v59, %v1108_v0  ;;  %v737_v61 = vcombine.high %v735_v52, %v1108_v0  ;;  %s867_s28 = sshll.u32 %s1117_s3, 4  ;;  %s868_s28 = int_to_ptr.vmem [resolvable:$true] %s867_s28 }
 0x529   :  { %s1072_s19 = scalar_lea.vmem %s868_s28, 32  ;;  %p1077_p5 = scmp.lt.s32.totalorder %s868_s28, %s868_s28 }
 0x52a   :  { %739 = vrot.lane.b32.xlu0 %v736_v60, %s1110_s1  ;;  %p1073_p4 = scmp.ne.s32.totalorder %s868_s28, %s1072_s19  ;;  %p1078_p6 = scmp.lt.s32.totalorder %s1072_s19, %s1072_s19 }
 0x52c   :  { %p1079_p7 = por %p1078_p6, %p1077_p5 }
 0x52e   :  { %747 = vrot.lane.b32.xlu0 %v737_v61, %s1111_s18  ;;  %p1080_p8 = pnand %p1079_p7, %p1073_p4 }
 0x59a   :  { %v744_v1 = vpop.permute.xlu1 %743 }
 0x59c   :  { %v740_v62 = vpop.permute.xlu0 %739 }
 0x59d   :  { %v750_v19 = vsel %vm103_vm1, %v728_v59, %v740_v62 }
 0x59e   :  { %v752_v2 = vsel %vm751_vm8, %v750_v19, %v744_v1 }
 0x5a0   :  { %v748_v3 = vpop.permute.xlu0 %747 }
 0x5a1   :  { %v754_v4 = vsel %vm753_vm9, %v752_v2, %v748_v3 }
 0x5a2   :  { %v755_v25 = vpack.c.bf16 %v754_v4, %v754_v4 }
 0x5a4   :  { %933 = vmatmul.mubr.bf16.vlgmr.msra.gmra.mrb[0].mxu1 %v755_v25 }
 0x677   :  { %v854_v5 = vpop.f32.mrb[0].mxu1 }
 0x678   :  { %860 = vst [vmem:[#allocation14] sm:$0x3] %v854_v5  ;;  %v934_v6 = vpop.f32.mrb[1].mxu1 }
 0x679   :  { %v857_v0 = vpop.f32.mrb[2].mxu1 }
 0x67a   :  { %1083 = shalt.err (!%p1080_p8)
}
 0x67b   :  { %s1084_s22 = scalar_lea.hbm %s1417_s5, 32 }
 0x67c   :  { %p1085_p9 = scmp.ne.s32.totalorder %s1417_s5, %s1084_s22  ;;  %p1088_p10 = scmp.lt.u32.totalorder %s1084_s22, %s1417_s5 }
 0x67e   :  { %p1090_p11 = pnand %p1088_p10, %p1085_p9 }
 0x680   :  { %1093 = shalt.err (!%p1090_p11)
}
 0x681   :  { %870 = dma.vmem_to_hbm [thread:$0]  %s868_s28, 32, %s1417_s5, [#allocation8]   ;;  %v935_v7 = vpop.f32.mrb[3].mxu1 }
 0x682   :  { %1100 = dma.done.wait [#allocation8], 32  }
 0x683   :  { %1101 = vsyncadd [#allocation8], 4294967264 }
 0x684   :  { %874 = vsyncpa [#allocation7], 1 }
 0x685   :  { %875 = vsyncpa [#allocation10], 1 }
 0x686   :  { %876 = vsyncpa [#allocation13], 1 }
 0x687   :  { %877 = vsyncpa [#allocation8], 1 }

</bundles_post_ra>
